<compile_context>
chip_gen: v5e
topology: v5e:2x2
jax: 0.10.0
libtpu: 0.0.40
codegen_flags: <defaults>
</compile_context>

<pallas_src>
import functools

import jax
import jax.numpy as jnp
from jax.experimental import pallas as pl
from jax.experimental.pallas import tpu as pltpu

HP = 128  # padded hidden / per-gate lane width


# --------------------------------------------------------------------------------------
# In-kernel helpers
# --------------------------------------------------------------------------------------
def _layer_norm_masked(y, gamma, beta, mask, n_real, eps=1e-5):
    """LayerNorm over the first n_real lanes only (padded lanes of y/gamma/beta are 0)."""
    mu = jnp.sum(y, axis=-1, keepdims=True) / n_real          # padded lanes contribute 0
    diff = (y - mu) * mask                                     # zero out padded lanes
    var = jnp.sum(diff * diff, axis=-1, keepdims=True) / n_real
    return diff * jax.lax.rsqrt(var + eps) * gamma + beta      # padded lanes -> 0


# --------------------------------------------------------------------------------------
# Kernel 1: hoisted input-to-hidden product for layer 0, all timesteps at once.
#   gi0[t*B + b, :] = x[t, b, :] @ [W_ir | W_iz | W_in]^T      (one full-M-tile matmul)
# --------------------------------------------------------------------------------------
def gi_precompute_kernel(x_ref, w_ref, o_ref):
    o_ref[...] = jnp.dot(x_ref[...], w_ref[...], preferred_element_type=jnp.float32)


# --------------------------------------------------------------------------------------
# Kernel 2: fused recurrent loop over T (grid axis, "arbitrary").
# --------------------------------------------------------------------------------------
def gru_seq_kernel(gi0_ref, h0_ref,
                   whh0_ref, br0_ref, bz0_ref, bin0_ref, bhn0_ref,
                   wcat1_ref, br1_ref, bz1_ref, bin1_ref, bhn1_ref,
                   ln_g_ref, ln_b_ref, wfc_ref, bfc_ref,
                   out_ref, hseq_ref,
                   h_scr,
                   *, hp, h_real, zoneout_prob):
    t = pl.program_id(0)
    p = zoneout_prob
    B = h_scr.shape[1]

    # Initialize the carried hidden state once (padded lanes of h0 are zero).
    @pl.when(t == 0)
    def _():
        h_scr[...] = h0_ref[...]

    # ------------------------------ layer 0 ------------------------------
    gi = gi0_ref[0]                                            # (B, 3*HP) f32, precomputed
    h_prev0 = h_scr[0]                                         # (B, HP)  f32
    gh = jnp.dot(h_prev0.astype(jnp.bfloat16), whh0_ref[...],
                 preferred_element_type=jnp.float32)           # (B, 3*HP) f32
    r0 = jax.nn.sigmoid(gi[:, 0:hp] + gh[:, 0:hp] + br0_ref[...])
    z0 = jax.nn.sigmoid(gi[:, hp:2 * hp] + gh[:, hp:2 * hp] + bz0_ref[...])
    n0 = jnp.tanh(gi[:, 2 * hp:3 * hp] + bin0_ref[...]
                  + r0 * (gh[:, 2 * hp:3 * hp] + bhn0_ref[...]))
    h_new0 = (1.0 - z0) * n0 + z0 * h_prev0
    h_l0 = p * h_prev0 + (1.0 - p) * h_new0                    # zoneout (eval mode)

    # LayerNorm over the real 100 lanes only, then ReLU (Dropout = identity in eval).
    lane = jax.lax.broadcasted_iota(jnp.int32, (1, hp), 1)
    mask = (lane < h_real).astype(jnp.float32)
    y = _layer_norm_masked(h_l0, ln_g_ref[...], ln_b_ref[...], mask, float(h_real))
    y = jnp.maximum(y, 0.0)

    # ------------------------------ layer 1 (fused concat matmul) ------------------------------
    h_prev1 = h_scr[1]
    xin = jnp.concatenate([y, h_prev1], axis=-1).astype(jnp.bfloat16)   # (B, 2*HP)
    g = jnp.dot(xin, wcat1_ref[...], preferred_element_type=jnp.float32)  # (B, 4*HP)
    r1 = jax.nn.sigmoid(g[:, 0:hp] + br1_ref[...])
    z1 = jax.nn.sigmoid(g[:, hp:2 * hp] + bz1_ref[...])
    n1 = jnp.tanh(g[:, 2 * hp:3 * hp] + bin1_ref[...]
                  + r1 * (g[:, 3 * hp:4 * hp] + bhn1_ref[...]))
    h_new1 = (1.0 - z1) * n1 + z1 * h_prev1
    h_l1 = p * h_prev1 + (1.0 - p) * h_new1

    # Carry the hidden state to the next timestep; padded lanes stay exactly 0.
    h_scr[0] = h_l0
    h_scr[1] = h_l1

    # Lane-dense streamed outputs.
    hseq_ref[0, 0] = h_l0
    hseq_ref[0, 1] = h_l1

    # FC head (N=1): VPU multiply + lane reduce; write lane-dense (broadcast over 128 lanes).
    val = jnp.sum(h_l1 * wfc_ref[...], axis=-1, keepdims=True) + bfc_ref[...]   # (B, 1)
    out_ref[0] = jnp.broadcast_to(val, (B, hp))


# --------------------------------------------------------------------------------------
# Host-side parameter preparation (PyTorch layout -> padded / bf16 kernel layout)
# --------------------------------------------------------------------------------------
def _round_up(n, m):
    return ((n + m - 1) // m) * m


def _pad_gate_cols(w_t, H, hp, rows, rows_p):
    """w_t: (rows, 3H) f32 -> (rows_p, 3*hp), each gate block padded independently."""
    out = jnp.zeros((rows_p, 3 * hp), jnp.float32)
    for g in range(3):
        out = out.at[:rows, g * hp:g * hp + H].set(w_t[:, g * H:(g + 1) * H])
    return out


def _padvec(v, H, hp):
    return jnp.zeros((1, hp), jnp.float32).at[0, :H].set(jnp.asarray(v, jnp.float32))


def prepare_params(raw, *, hidden_size, input_size, hp=HP):
    """raw = (w_ih0, w_hh0, b_ih0, b_hh0, w_ih1, w_hh1, b_ih1, b_hh1,
              ln_g, ln_b, fc_w, fc_b) in PyTorch layouts (gate order r|z|n)."""
    (w_ih0, w_hh0, b_ih0, b_hh0,
     w_ih1, w_hh1, b_ih1, b_hh1,
     ln_g, ln_b, fc_w, fc_b) = raw
    H = hidden_size
    DP = _round_up(input_size, 128)

    # Layer 0: input weights (hoisted off the recurrent path) and hidden weights.
    wih0_cat = _pad_gate_cols(w_ih0.T.astype(jnp.float32), H, hp, input_size, DP)
    whh0_p = _pad_gate_cols(w_hh0.T.astype(jnp.float32), H, hp, H, hp)
    br0 = _padvec(b_ih0[0:H] + b_hh0[0:H], H, hp)           # fold r biases
    bz0 = _padvec(b_ih0[H:2 * H] + b_hh0[H:2 * H], H, hp)   # fold z biases
    bin0 = _padvec(b_ih0[2 * H:3 * H], H, hp)               # n gate: input bias
    bhn0 = _padvec(b_hh0[2 * H:3 * H], H, hp)               # n gate: hidden bias (inside r*)

    # Layer 1: one fused [y ; h](2*hp) -> [r | z | n_in | n_hid](4*hp) weight so a single
    # matmul per step produces gi_r+gh_r, gi_z+gh_z, gi_n and gh_n in separate lane blocks.
    wih1_t = w_ih1.T.astype(jnp.float32)   # (H, 3H)
    whh1_t = w_hh1.T.astype(jnp.float32)   # (H, 3H)
    wcat1 = jnp.zeros((2 * hp, 4 * hp), jnp.float32)
    for g in range(3):  # r, z, n_in from the layer input y
        wcat1 = wcat1.at[:H, g * hp:g * hp + H].set(wih1_t[:, g * H:(g + 1) * H])
    for g in range(2):  # r, z from the hidden state
        wcat1 = wcat1.at[hp:hp + H, g * hp:g * hp + H].set(whh1_t[:, g * H:(g + 1) * H])
    wcat1 = wcat1.at[hp:hp + H, 3 * hp:3 * hp + H].set(whh1_t[:, 2 * H:3 * H])  # n_hid
    br1 = _padvec(b_ih1[0:H] + b_hh1[0:H], H, hp)
    bz1 = _padvec(b_ih1[H:2 * H] + b_hh1[H:2 * H], H, hp)
    bin1 = _padvec(b_ih1[2 * H:3 * H], H, hp)
    bhn1 = _padvec(b_hh1[2 * H:3 * H], H, hp)

    ln_g_p = _padvec(ln_g, H, hp)                            # padded gamma MUST be 0
    ln_b_p = _padvec(ln_b, H, hp)
    wfc_row = _padvec(jnp.asarray(fc_w).reshape(-1), H, hp)
    bfc = jnp.asarray(fc_b, jnp.float32).reshape(1, 1)

    return (wih0_cat.astype(jnp.bfloat16), whh0_p.astype(jnp.bfloat16),
            br0, bz0, bin0, bhn0,
            wcat1.astype(jnp.bfloat16), br1, bz1, bin1, bhn1,
            ln_g_p, ln_b_p, wfc_row, bfc)


# --------------------------------------------------------------------------------------
# Wrapper: one pallas_call for the whole sequence (T module-forward steps fused).
# --------------------------------------------------------------------------------------
def gru_rnn_forward_seq(x_seq, h0, params, *, hidden_size, hp=HP, zoneout_prob=0.25):
    """x_seq: (T, B, D_in) f32; h0: (L, B, H) f32; params from prepare_params().

    Each grid step t reproduces exactly one call of GRURNN.forward with `hidden` equal to
    the previous step's hidden_state_sequence (h0 for t=0). Returns
    (final_output (T,B,1), hidden_state_sequence (T,L,B,H)). Use T=1 for a single step.
    """
    T, B, d_in = x_seq.shape
    L = h0.shape[0]
    (wih0_cat, whh0_p, br0, bz0, bin0, bhn0,
     wcat1, br1, bz1, bin1, bhn1,
     ln_g_p, ln_b_p, wfc_row, bfc) = params
    DP = wih0_cat.shape[0]

    # ---- stage 1: hoist layer-0's x @ W_ih for all T timesteps (one full-M matmul) ----
    tb = T * B
    tb_p = _round_up(tb, 8)
    x_flat = jnp.zeros((tb_p, DP), jnp.bfloat16)
    x_flat = x_flat.at[:tb, :d_in].set(x_seq.reshape(tb, d_in).astype(jnp.bfloat16))
    vmem = pl.BlockSpec(memory_space=pltpu.MemorySpace.VMEM)
    gi0_flat = pl.pallas_call(
        gi_precompute_kernel,
        out_shape=jax.ShapeDtypeStruct((tb_p, 3 * hp), jnp.float32),
        in_specs=[vmem, vmem],
        out_specs=vmem,
    )(x_flat, wih0_cat)
    gi0 = gi0_flat[:tb].reshape(T, B, 3 * hp)

    # ---- stage 2: fused recurrent loop ----
    h0_p = jnp.zeros((L, B, hp), jnp.float32).at[:, :, :hidden_size].set(h0)

    kern = functools.partial(gru_seq_kernel, hp=hp, h_real=hidden_size,
                             zoneout_prob=zoneout_prob)

    const2 = lambda t: (0, 0)
    const3 = lambda t: (0, 0, 0)
    in_specs = [
        pl.BlockSpec((1, B, 3 * hp), lambda t: (t, 0, 0)),   # gi0 streamed per step
        pl.BlockSpec((L, B, hp), const3),                    # h0 resident (read at t==0)
        pl.BlockSpec(whh0_p.shape, const2),                  # resident weights / biases
        pl.BlockSpec(br0.shape, const2),
        pl.BlockSpec(bz0.shape, const2),
        pl.BlockSpec(bin0.shape, const2),
        pl.BlockSpec(bhn0.shape, const2),
        pl.BlockSpec(wcat1.shape, const2),
        pl.BlockSpec(br1.shape, const2),
        pl.BlockSpec(bz1.shape, const2),
        pl.BlockSpec(bin1.shape, const2),
        pl.BlockSpec(bhn1.shape, const2),
        pl.BlockSpec(ln_g_p.shape, const2),
        pl.BlockSpec(ln_b_p.shape, const2),
        pl.BlockSpec(wfc_row.shape, const2),
        pl.BlockSpec(bfc.shape, const2),
    ]
    out_specs = (
        pl.BlockSpec((1, B, hp), lambda t: (t, 0, 0)),           # lane-dense FC output
        pl.BlockSpec((1, L, B, hp), lambda t: (t, 0, 0, 0)),     # lane-dense hseq
    )
    out_shapes = (jax.ShapeDtypeStruct((T, B, hp), jnp.float32),
                  jax.ShapeDtypeStruct((T, L, B, hp), jnp.float32))

    out_p, hseq_p = pl.pallas_call(
        kern,
        grid=(T,),
        out_shape=out_shapes,
        in_specs=in_specs,
        out_specs=out_specs,
        scratch_shapes=[pltpu.VMEM((L, B, hp), jnp.float32)],    # carried hidden state
        compiler_params=pltpu.CompilerParams(
            dimension_semantics=("arbitrary",)),                 # sequential recurrence
    )(gi0, h0_p, whh0_p, br0, bz0, bin0, bhn0,
      wcat1, br1, bz1, bin1, bhn1, ln_g_p, ln_b_p, wfc_row, bfc)

    return out_p[:, :, 0:1], hseq_p[:, :, :, :hidden_size]


# --------------------------------------------------------------------------------------
# Pure-JAX reference (PyTorch semantics, unpadded, f32) for a correctness check.
# --------------------------------------------------------------------------------------
def _ref_step(x, hidden, raw, *, hidden_size, zoneout_prob, eps=1e-5):
    (w_ih0, w_hh0, b_ih0, b_hh0,
     w_ih1, w_hh1, b_ih1, b_hh1,
     ln_g, ln_b, fc_w, fc_b) = raw
    H, p = hidden_size, zoneout_prob

    def cell(xx, hh, w_ih, w_hh, b_ih, b_hh):
        gi = xx @ w_ih.T + b_ih
        gh = hh @ w_hh.T + b_hh
        r = jax.nn.sigmoid(gi[:, :H] + gh[:, :H])
        z = jax.nn.sigmoid(gi[:, H:2 * H] + gh[:, H:2 * H])
        n = jnp.tanh(gi[:, 2 * H:] + r * gh[:, 2 * H:])
        return (1.0 - z) * n + z * hh

    h_new0 = cell(x, hidden[0], w_ih0, w_hh0, b_ih0, b_hh0)
    hL0 = p * hidden[0] + (1.0 - p) * h_new0
    mu = jnp.mean(hL0, axis=-1, keepdims=True)
    var = jnp.mean((hL0 - mu) ** 2, axis=-1, keepdims=True)
    y = (hL0 - mu) * jax.lax.rsqrt(var + eps) * ln_g + ln_b
    y = jnp.maximum(y, 0.0)
    h_new1 = cell(y, hidden[1], w_ih1, w_hh1, b_ih1, b_hh1)
    hL1 = p * hidden[1] + (1.0 - p) * h_new1
    out = hL1 @ fc_w.T + fc_b
    return out, jnp.stack([hL0, hL1], axis=0)


def _ref_forward_seq(x_seq, h0, raw, *, hidden_size, zoneout_prob):
    hidden = h0
    outs, hseqs = [], []
    for t in range(x_seq.shape[0]):
        out_t, hs_t = _ref_step(x_seq[t], hidden, raw,
                                hidden_size=hidden_size, zoneout_prob=zoneout_prob)
        hidden = hs_t
        outs.append(out_t)
        hseqs.append(hs_t)
    return jnp.stack(outs, axis=0), jnp.stack(hseqs, axis=0)


if __name__ == "__main__":
    # GRURNN(input_size=92, hidden_size=100, num_layers=2, output_size=1) defaults.
    input_size = 46 * 2      # 92
    hidden_size = 100
    num_layers = 2
    output_size = 1
    zoneout_prob = 0.25
    batch = 8                # fill all 8 sublanes of a vreg
    seq_len = 8              # T module-forward steps fused into one pallas_call

    key = jax.random.PRNGKey(0)
    keys = jax.random.split(key, 12)

    def u(k, shape, bound):
        return jax.random.uniform(k, shape, jnp.float32, -bound, bound)

    bound = 1.0 / float(jnp.sqrt(hidden_size))   # PyTorch GRUCell / Linear init bound

    # PyTorch-layout raw parameters (gate order r|z|n).
    w_ih0 = u(keys[0], (3 * hidden_size, input_size), bound)
    w_hh0 = u(keys[1], (3 * hidden_size, hidden_size), bound)
    b_ih0 = u(keys[2], (3 * hidden_size,), bound)
    b_hh0 = u(keys[3], (3 * hidden_size,), bound)
    w_ih1 = u(keys[4], (3 * hidden_size, hidden_size), bound)
    w_hh1 = u(keys[5], (3 * hidden_size, hidden_size), bound)
    b_ih1 = u(keys[6], (3 * hidden_size,), bound)
    b_hh1 = u(keys[7], (3 * hidden_size,), bound)
    ln_g = jnp.ones((hidden_size,), jnp.float32)
    ln_b = jnp.zeros((hidden_size,), jnp.float32)
    fc_w = u(keys[8], (output_size, hidden_size), bound)
    fc_b = u(keys[9], (output_size,), bound)

    raw = (w_ih0, w_hh0, b_ih0, b_hh0, w_ih1, w_hh1, b_ih1, b_hh1,
           ln_g, ln_b, fc_w, fc_b)
    params = prepare_params(raw, hidden_size=hidden_size, input_size=input_size, hp=HP)

    x_seq = jax.random.normal(keys[10], (seq_len, batch, input_size), jnp.float32)
    # Reference init_hidden() is zeros(num_layers, hidden_size); broadcast over batch.
    h0 = jnp.zeros((num_layers, batch, hidden_size), jnp.float32)

    final_out, hseq = gru_rnn_forward_seq(x_seq, h0, params,
                                          hidden_size=hidden_size,
                                          zoneout_prob=zoneout_prob)
    jax.block_until_ready((final_out, hseq))

    assert final_out.shape == (seq_len, batch, output_size)
    assert hseq.shape == (seq_len, num_layers, batch, hidden_size)
    assert bool(jnp.all(jnp.isfinite(final_out))) and bool(jnp.all(jnp.isfinite(hseq)))

    # Correctness check against the unpadded f32 PyTorch-semantics reference, looped over
    # the same T steps with the hidden state carried between steps (tolerance reflects
    # bf16 MXU weights / bf16-cast activations with f32 accumulation).
    ref_out, ref_hseq = _ref_forward_seq(x_seq, h0, raw, hidden_size=hidden_size,
                                         zoneout_prob=zoneout_prob)
    assert jnp.allclose(final_out, ref_out, atol=2e-2, rtol=2e-2), \
        float(jnp.max(jnp.abs(final_out - ref_out)))
    assert jnp.allclose(hseq, ref_hseq, atol=2e-2, rtol=2e-2), \
        float(jnp.max(jnp.abs(hseq - ref_hseq)))

    print("KERNEL_OK")
</pallas_src>

<mosaic_0001>
module attributes {stable_mosaic.version = 11 : i64} {
  func.func @gi_precompute_kernel(%arg0: memref<64x128xbf16, #tpu.memory_space<vmem>>, %arg1: memref<128x384xbf16, #tpu.memory_space<vmem>>, %arg2: memref<64x384xf32, #tpu.memory_space<vmem>>) attributes {dimension_semantics = [], scalar_prefetch = 0 : i64, scratch_operands = 0 : i64, tpu.core_type = #tpu.core_type<tc>} {
    %c0 = arith.constant 0 : index
    %c0_0 = arith.constant 0 : index
    %0 = vector.load %arg0[%c0, %c0_0] : memref<64x128xbf16, #tpu.memory_space<vmem>>, vector<64x128xbf16>
    %c0_1 = arith.constant 0 : index
    %c0_2 = arith.constant 0 : index
    %1 = vector.load %arg1[%c0_1, %c0_2] : memref<128x384xbf16, #tpu.memory_space<vmem>>, vector<128x384xbf16>
    %cst = arith.constant dense<0.000000e+00> : vector<64x384xf32>
    %2 = tpu.matmul %0, %1, %cst {dimension_numbers = #tpu.dot_dimension_numbers<[1], [0], [0], [1], [0, 0, 1, 1], [], []>} : vector<64x128xbf16>, vector<128x384xbf16>, vector<64x384xf32> -> vector<64x384xf32>
    %c0_3 = arith.constant 0 : index
    %c0_4 = arith.constant 0 : index
    %3 = vector.load %arg2[%c0_3, %c0_4] : memref<64x384xf32, #tpu.memory_space<vmem>>, vector<64x384xf32>
    tpu.vector_store %arg2[%c0_3, %c0_4], %2 {strides = array<i32>} : memref<64x384xf32, #tpu.memory_space<vmem>>, vector<64x384xf32>,
    return
  }
}

</mosaic_0001>

<bundles_post_ra>
// kernel: tpu_custom_call.1
= control target key start
LH: loop header
LB: loop body
LE: loop exit
PB: predicated region body
PF: predicated region fallthrough
CT: control target
= control target key end

     0   :  { %7 = vsyncpa [#allocation3], 0  ;;  %s635_s0 = inlined_call_operand.hbm [shape: bf16[64,128], index: 0, kind: input, shape index: {}]   ;;  %s636_s1 = inlined_call_operand.hbm [shape: bf16[128,384], index: 1, kind: input, shape index: {}]   ;;  %s637_s2 = inlined_call_operand.hbm [shape: f32[64,384], index: 2, kind: output, shape index: {}]  }
   0x1   :  { %8 = vsyncpa [#allocation6], 0 }
   0x2   :  { %9 = vsyncpa [#allocation4], 0  ;;  %s14_s11 = sshll.u32 %s635_s0, 4  ;;  %s602_s12 = smov [#allocation2]   ;;  %s15_s11 = int_to_ptr.hbm [resolvable:$true] %s14_s11 }
   0x3   :  { %s16_s13 = sshll.u32 %s602_s12, 4  ;;  %s27_s16 = sshll.u32 %s636_s1, 4  ;;  %s17_s13 = int_to_ptr.vmem [resolvable:$true] %s16_s13  ;;  %s28_s16 = int_to_ptr.hbm [resolvable:$true] %s27_s16 }
   0x4   :  { %s603_s17 = smov 64   ;;  %s604_s18 = smov 4  }
   0x5   :  { %22 = dma.hbm_to_vmem [thread:$0]  %s15_s11, 512, %s17_s13, [#allocation3], %s603_s17, %s603_s17, %s604_s18  }
   0x6   :  { %s605_s19 = smov [#allocation5]   ;;  %s606_s21 = smov 192  }
   0x7   :  { %s29_s20 = sshll.u32 %s605_s19, 4  ;;  %s607_s22 = smov 12   ;;  %s30_s20 = int_to_ptr.vmem [resolvable:$true] %s29_s20 }
   0x8   :  { %35 = dma.hbm_to_vmem [thread:$0]  %s28_s16, 3072, %s30_s20, [#allocation6], %s606_s21, %s606_s21, %s607_s22  }
   0x9   :  { %596 = dma.done.wait [#allocation3], 512  }
   0xa   :  { %597 = vsyncadd [#allocation3], 4294966784 }
   0xb   :  { %598 = dma.done.wait [#allocation6], 3072  }
   0xc   :  { %599 = vsyncadd [#allocation6], 4294964224  ;;  %v504_v0 = vld [vmem:[#allocation5 + $0xac] sm:$0xf]  ;;  %v471_v1 = vld [vmem:[#allocation5 + $0xb4] sm:$0xf0] }
   0xd   :  { %v477_v2 = vld [vmem:[#allocation5 + $0xb0] sm:$0xf]  ;;  %v474_v3 = vor.u32 %v504_v0, %v471_v1  ;;  %v506_v4 = vld [vmem:[#allocation5 + $0xb8] sm:$0xf0]  ;;  %v501_v5 = vld [vmem:[#allocation5 + $0x94] sm:$0xf] }
   0xe   :  { %v459_v6 = vld [vmem:[#allocation5 + $0x9c] sm:$0xf0]  ;;  %v478_v7 = vor.u32 %v506_v4, %v477_v2  ;;  %v465_v8 = vld [vmem:[#allocation5 + $0x98] sm:$0xf]  ;;  %v503_v9 = vld [vmem:[#allocation5 + $0xa0] sm:$0xf0] }
   0xf   :  { %v469_v10 = vld [vmem:[#allocation5 + $0xa8] sm:$0xf]  ;;  %265 = vmatpush.bf16.msra.mxu1 %v474_v3  ;;  %v462_v11 = vor.u32 %v501_v5, %v459_v6  ;;  %v505_v12 = vld [vmem:[#allocation5 + $0xb0] sm:$0xf0]  ;;  %v466_v13 = vor.u32 %v503_v9, %v465_v8  ;;  %v498_v15 = vld [vmem:[#allocation5 + $0x7c] sm:$0xf] }
  0x10   :  { %294 = vmatpush.bf16.msra.mxu2 %v478_v7  ;;  %v470_v14 = vor.u32 %v505_v12, %v469_v10  ;;  %v447_v16 = vld [vmem:[#allocation5 + $0x84] sm:$0xf0]  ;;  %v457_v17 = vld [vmem:[#allocation5 + $0x90] sm:$0xf]  ;;  %v453_v18 = vld [vmem:[#allocation5 + $0x80] sm:$0xf] }
  0x11   :  { %v500_v19 = vld [vmem:[#allocation5 + $0x88] sm:$0xf0]  ;;  %v502_v20 = vld [vmem:[#allocation5 + $0x98] sm:$0xf0]  ;;  %v450_v22 = vor.u32 %v498_v15, %v447_v16  ;;  %v445_v23 = vld [vmem:[#allocation5 + $0x78] sm:$0xf] }
  0x12   :  { %507 = vmatpush.bf16.msra.mxu3 %v470_v14  ;;  %v458_v21 = vor.u32 %v502_v20, %v457_v17  ;;  %236 = vmatpush.bf16.msra.mxu0 %v470_v14  ;;  %v499_v24 = vld [vmem:[#allocation5 + $0x80] sm:$0xf0]  ;;  %v454_v25 = vor.u32 %v500_v19, %v453_v18  ;;  %v435_v27 = vld [vmem:[#allocation5 + $0x6c] sm:$0xf0]  ;;  %v441_v28 = vld [vmem:[#allocation5 + $0x68] sm:$0xf] }
  0x13   :  { %266 = vmatpush.bf16.msra.mxu1 %v462_v11  ;;  %v495_v26 = vld [vmem:[#allocation5 + $0x64] sm:$0xf]  ;;  %v497_v29 = vld [vmem:[#allocation5 + $0x70] sm:$0xf0]  ;;  %v446_v30 = vor.u32 %v499_v24, %v445_v23  ;;  %v433_v32 = vld [vmem:[#allocation5 + $0x60] sm:$0xf] }
  0x14   :  { %295 = vmatpush.bf16.msra.mxu2 %v466_v13  ;;  %v438_v31 = vor.u32 %v495_v26, %v435_v27  ;;  %v496_v33 = vld [vmem:[#allocation5 + $0x68] sm:$0xf0]  ;;  %v442_v34 = vor.u32 %v497_v29, %v441_v28  ;;  %v423_v36 = vld [vmem:[#allocation5 + $0x54] sm:$0xf0]  ;;  %v429_v37 = vld [vmem:[#allocation5 + $0x50] sm:$0xf] }
  0x15   :  { %v492_v35 = vld [vmem:[#allocation5 + $0x4c] sm:$0xf]  ;;  %v494_v38 = vld [vmem:[#allocation5 + $0x58] sm:$0xf0]  ;;  %v434_v39 = vor.u32 %v496_v33, %v433_v32  ;;  %v421_v41 = vld [vmem:[#allocation5 + $0x48] sm:$0xf] }
  0x16   :  { %508 = vmatpush.bf16.msra.mxu3 %v458_v21  ;;  %237 = vmatpush.bf16.msra.mxu0 %v458_v21  ;;  %v426_v40 = vor.u32 %v492_v35, %v423_v36  ;;  %v493_v42 = vld [vmem:[#allocation5 + $0x50] sm:$0xf0]  ;;  %v430_v43 = vor.u32 %v494_v38, %v429_v37  ;;  %v411_v45 = vld [vmem:[#allocation5 + $0x3c] sm:$0xf0]  ;;  %v417_v46 = vld [vmem:[#allocation5 + $0x38] sm:$0xf] }
  0x17   :  { %267 = vmatpush.bf16.msra.mxu1 %v450_v22  ;;  %v489_v44 = vld [vmem:[#allocation5 + $0x34] sm:$0xf]  ;;  %v491_v47 = vld [vmem:[#allocation5 + $0x40] sm:$0xf0]  ;;  %v422_v48 = vor.u32 %v493_v42, %v421_v41  ;;  %v409_v50 = vld [vmem:[#allocation5 + $0x30] sm:$0xf] }
  0x18   :  { %296 = vmatpush.bf16.msra.mxu2 %v454_v25  ;;  %v414_v49 = vor.u32 %v489_v44, %v411_v45  ;;  %v490_v51 = vld [vmem:[#allocation5 + $0x38] sm:$0xf0]  ;;  %v418_v52 = vor.u32 %v491_v47, %v417_v46  ;;  %v399_v54 = vld [vmem:[#allocation5 + $0x24] sm:$0xf0]  ;;  %v405_v55 = vld [vmem:[#allocation5 + $0x20] sm:$0xf] }
  0x19   :  { %v486_v53 = vld [vmem:[#allocation5 + $0x1c] sm:$0xf]  ;;  %v488_v56 = vld [vmem:[#allocation5 + $0x28] sm:$0xf0]  ;;  %v410_v57 = vor.u32 %v490_v51, %v409_v50  ;;  %v397_v59 = vld [vmem:[#allocation5 + $0x18] sm:$0xf] }
  0x1a   :  { %509 = vmatpush.bf16.msra.mxu3 %v446_v30  ;;  %238 = vmatpush.bf16.msra.mxu0 %v446_v30  ;;  %v402_v58 = vor.u32 %v486_v53, %v399_v54  ;;  %v487_v60 = vld [vmem:[#allocation5 + $0x20] sm:$0xf0]  ;;  %v406_v61 = vor.u32 %v488_v56, %v405_v55  ;;  %v387_v63 = vld [vmem:[#allocation5 + $0xc] sm:$0xf0]  ;;  %v393_v0 = vld [vmem:[#allocation5 + $0x8] sm:$0xf] }
  0x1b   :  { %268 = vmatpush.bf16.msra.mxu1 %v438_v31  ;;  %v483_v62 = vld [vmem:[#allocation5 + $0x4] sm:$0xf]  ;;  %v485_v1 = vld [vmem:[#allocation5 + $0x10] sm:$0xf0]  ;;  %v398_v2 = vor.u32 %v487_v60, %v397_v59  ;;  %v385_v4 = vld [vmem:[#allocation5] sm:$0xf] }
  0x1c   :  { %297 = vmatpush.bf16.msra.mxu2 %v442_v34  ;;  %v390_v3 = vor.u32 %v483_v62, %v387_v63  ;;  %v484_v5 = vld [vmem:[#allocation5 + $0x8] sm:$0xf0]  ;;  %v394_v6 = vor.u32 %v485_v1, %v393_v0  ;;  %v479_v7 = vld [vmem:[#allocation2] sm:$0xff]  ;;  %v481_v10 = vld [vmem:[#allocation2 + $0x10] sm:$0xff]  ;;  %s608_s0 = smov [#allocation7]   ;;  %s353_s25 = sshll.u32 %s637_s2, 4  ;;  %s354_s25 = int_to_ptr.hbm [resolvable:$true] %s353_s25 }
  0x1d   :  { %v386_v8 = vor.u32 %v484_v5, %v385_v4  ;;  %v480_v9 = vld [vmem:[#allocation2 + $0x8] sm:$0xff]  ;;  %v482_v11 = vld [vmem:[#allocation2 + $0x18] sm:$0xff]  ;;  %s351_s1 = sshll.u32 %s608_s0, 4  ;;  %s609_s26 = smov 384   ;;  %s352_s1 = int_to_ptr.vmem [resolvable:$true] %s351_s1 }
  0x1e   :  { %510 = vmatpush.bf16.msra.mxu3 %v434_v39  ;;  %239 = vmatpush.bf16.msra.mxu0 %v434_v39  ;;  %s610_s27 = smov 24  }
  0x1f   :  { %269 = vmatpush.bf16.msra.mxu1 %v426_v40 }
  0x20   :  { %298 = vmatpush.bf16.msra.mxu2 %v430_v43 }
  0x22   :  { %511 = vmatpush.bf16.msra.mxu3 %v422_v48  ;;  %240 = vmatpush.bf16.msra.mxu0 %v422_v48 }
  0x23   :  { %270 = vmatpush.bf16.msra.mxu1 %v414_v49 }
  0x24   :  { %299 = vmatpush.bf16.msra.mxu2 %v418_v52 }
  0x26   :  { %512 = vmatpush.bf16.msra.mxu3 %v410_v57  ;;  %241 = vmatpush.bf16.msra.mxu0 %v410_v57 }
  0x27   :  { %271 = vmatpush.bf16.msra.mxu1 %v402_v58 }
  0x28   :  { %300 = vmatpush.bf16.msra.mxu2 %v406_v61 }
  0x2a   :  { %513 = vmatpush.bf16.msra.mxu3 %v398_v2  ;;  %242 = vmatpush.bf16.msra.mxu0 %v398_v2 }
  0x2b   :  { %272 = vmatpush.bf16.msra.mxu1 %v390_v3 }
  0x2c   :  { %301 = vmatpush.bf16.msra.mxu2 %v394_v6 }
  0x2e   :  { %273 = vmatmul.bf16.vlgmr.msra.gmra.mxu1 %v479_v7  ;;  %514 = vmatpush.bf16.msra.mxu3 %v386_v8 }
  0x2f   :  { %302 = vmatmul.bf16.vlgmr.msra.gmra.mxu2 %v479_v7  ;;  %243 = vmatpush.bf16.msra.mxu0 %v386_v8 }
  0x31   :  { %249 = vmatmul.bf16.vlgmr.msra.gmra.mxu3 %v480_v9 }
  0x32   :  { %244 = vmatmul.bf16.vlgmr.msra.gmra.mxu0 %v479_v7 }
  0x3e   :  { %278 = vmatmul.bf16.gmra.mxu1 %v480_v9 }
  0x3f   :  { %307 = vmatmul.bf16.gmra.mxu2 %v480_v9 }
  0x41   :  { %254 = vmatmul.bf16.gmra.mxu3 %v481_v10 }
  0x4e   :  { %283 = vmatmul.bf16.gmra.mxu1 %v481_v10 }
  0x4f   :  { %312 = vmatmul.bf16.gmra.mxu2 %v481_v10 }
  0x51   :  { %259 = vmatmul.bf16.gmra.mxu3 %v482_v11 }
  0x5e   :  { %288 = vmatmul.bf16.gmra.mxu1 %v482_v11 }
  0x5f   :  { %317 = vmatmul.bf16.gmra.mxu2 %v482_v11 }
  0xab   :  { %v274_v12 = vpop.f32.mrf.mxu1 }
  0xac   :  { %324 = vst [vmem:[#allocation7 + $0x8] sm:$0xff] %v274_v12 }
  0xaf   :  { %v245_v16 = vpop.f32.mrf.mxu0 }
  0xb0   :  { %323 = vst [vmem:[#allocation7] sm:$0xff] %v245_v16 }
  0xb2   :  { %v303_v13 = vpop.f32.mrf.mxu2 }
  0xb3   :  { %325 = vst [vmem:[#allocation7 + $0x10] sm:$0xff] %v303_v13  ;;  %v276_v14 = vpop.f32.mrf.mxu1 }
  0xb4   :  { %327 = vst [vmem:[#allocation7 + $0x20] sm:$0xff] %v276_v14  ;;  %v250_v15 = vpop.f32.mrf.mxu3 }
  0xb5   :  { %329 = vst [vmem:[#allocation7 + $0x30] sm:$0xff] %v250_v15 }
  0xb7   :  { %v247_v20 = vpop.f32.mrf.mxu0 }
  0xb8   :  { %326 = vst [vmem:[#allocation7 + $0x18] sm:$0xff] %v247_v20 }
  0xba   :  { %v305_v17 = vpop.f32.mrf.mxu2 }
  0xbb   :  { %328 = vst [vmem:[#allocation7 + $0x28] sm:$0xff] %v305_v17  ;;  %v279_v18 = vpop.f32.mrf.mxu1 }
  0xbc   :  { %330 = vst [vmem:[#allocation7 + $0x38] sm:$0xff] %v279_v18  ;;  %v252_v19 = vpop.f32.mrf.mxu3 }
  0xbd   :  { %332 = vst [vmem:[#allocation7 + $0x48] sm:$0xff] %v252_v19 }
  0xc2   :  { %v308_v21 = vpop.f32.mrf.mxu2 }
  0xc3   :  { %331 = vst [vmem:[#allocation7 + $0x40] sm:$0xff] %v308_v21  ;;  %v281_v22 = vpop.f32.mrf.mxu1 }
  0xc4   :  { %333 = vst [vmem:[#allocation7 + $0x50] sm:$0xff] %v281_v22  ;;  %v255_v23 = vpop.f32.mrf.mxu3 }
  0xc5   :  { %335 = vst [vmem:[#allocation7 + $0x60] sm:$0xff] %v255_v23 }
  0xca   :  { %v310_v24 = vpop.f32.mrf.mxu2 }
  0xcb   :  { %334 = vst [vmem:[#allocation7 + $0x58] sm:$0xff] %v310_v24  ;;  %v284_v25 = vpop.f32.mrf.mxu1 }
  0xcc   :  { %336 = vst [vmem:[#allocation7 + $0x68] sm:$0xff] %v284_v25  ;;  %v257_v26 = vpop.f32.mrf.mxu3 }
  0xcd   :  { %338 = vst [vmem:[#allocation7 + $0x78] sm:$0xff] %v257_v26 }
  0xd2   :  { %v313_v27 = vpop.f32.mrf.mxu2 }
  0xd3   :  { %337 = vst [vmem:[#allocation7 + $0x70] sm:$0xff] %v313_v27  ;;  %v286_v28 = vpop.f32.mrf.mxu1 }
  0xd4   :  { %339 = vst [vmem:[#allocation7 + $0x80] sm:$0xff] %v286_v28  ;;  %v260_v29 = vpop.f32.mrf.mxu3 }
  0xd5   :  { %341 = vst [vmem:[#allocation7 + $0x90] sm:$0xff] %v260_v29 }
  0xda   :  { %v315_v30 = vpop.f32.mrf.mxu2 }
  0xdb   :  { %340 = vst [vmem:[#allocation7 + $0x88] sm:$0xff] %v315_v30  ;;  %v289_v31 = vpop.f32.mrf.mxu1 }
  0xdc   :  { %342 = vst [vmem:[#allocation7 + $0x98] sm:$0xff] %v289_v31  ;;  %v262_v32 = vpop.f32.mrf.mxu3 }
  0xdd   :  { %344 = vst [vmem:[#allocation7 + $0xa8] sm:$0xff] %v262_v32 }
  0xe2   :  { %v318_v33 = vpop.f32.mrf.mxu2 }
  0xe3   :  { %343 = vst [vmem:[#allocation7 + $0xa0] sm:$0xff] %v318_v33  ;;  %v291_v34 = vpop.f32.mrf.mxu1 }
  0xe4   :  { %345 = vst [vmem:[#allocation7 + $0xb0] sm:$0xff] %v291_v34 }
  0xea   :  { %v320_v35 = vpop.f32.mrf.mxu2 }
  0xeb   :  { %346 = vst [vmem:[#allocation7 + $0xb8] sm:$0xff] %v320_v35 }
  0xec   :  { %359 = dma.vmem_to_hbm [thread:$0]  %s352_s1, 3072, %s354_s25, [#allocation4], %s609_s26, %s609_s26, %s610_s27  }
  0xed   :  { %600 = dma.done.wait [#allocation4], 3072  }
  0xee   :  { %601 = vsyncadd [#allocation4], 4294964224 }
  0xef   :  { %364 = vsyncpa [#allocation3], 1 }
  0xf0   :  { %365 = vsyncpa [#allocation6], 1 }
  0xf1   :  { %366 = vsyncpa [#allocation4], 1 }

</bundles_post_ra>
